<compile_context>
chip_gen: v6e
topology: v6e:2x2x1
jax: 0.10.0
libtpu: 0.0.40
codegen_flags: <defaults>
</compile_context>

<pallas_src>
import functools
import math

import jax
import jax.numpy as jnp
from jax.experimental import pallas as pl
from jax.experimental.pallas import tpu as pltpu

_HIDDEN = 128
_OUT_PAD = 128  # lane-dense padded output width


def _round_up(x, m):
    return ((x + m - 1) // m) * m


def _policy_kernel(x_ref, w1_ref, b1_ref, w2_ref, b2_ref, w3_ref, b3_ref,
                   o_ref, *, use_softmax: bool):
    # linear1 + relu   (bf16 MXU operands, f32 accumulation, f32 elementwise)
    x = x_ref[...].astype(jnp.bfloat16)
    h1 = jnp.dot(x, w1_ref[...], preferred_element_type=jnp.float32)
    h1 = jnp.maximum(h1 + b1_ref[...], 0.0)

    # linear2 + relu
    h2 = jnp.dot(h1.astype(jnp.bfloat16), w2_ref[...],
                 preferred_element_type=jnp.float32)
    h2 = jnp.maximum(h2 + b2_ref[...], 0.0)

    # linear3 (output padded to 128 lanes; padded bias is -1e30 on the
    # softmax path so padded columns contribute exp()==0)
    logits = jnp.dot(h2.astype(jnp.bfloat16), w3_ref[...],
                     preferred_element_type=jnp.float32)
    logits = logits + b3_ref[...]

    if use_softmax:
        m = jnp.max(logits, axis=-1, keepdims=True)
        e = jnp.exp(logits - m)
        s = jnp.sum(e, axis=-1, keepdims=True)
        o_ref[...] = (e * pl.reciprocal(s, approx=True)).astype(o_ref.dtype)
    else:
        o_ref[...] = logits.astype(o_ref.dtype)


@functools.partial(jax.jit, static_argnames=("action_size", "block_b"))
def policy_net_forward(state, params, action_size, *, block_b=512):
    """PolicyNet forward pass as one batch-gridded Pallas kernel.

    state  : (B, state_size) f32
    params : (W1, b1, W2, b2, W3, b3) with W_i pre-transposed to (in, out) bf16
             and b_i as (1, out) f32.
    block_b: batch rows per grid step (multiple of 8; sweep 256-1024).
    """
    w1, b1, w2, b2, w3, b3 = params
    B, S = state.shape
    out_dim = action_size if action_size > 0 else 1

    # --- pad the final layer to a lane-dense 128-wide output ----------------
    pad_cols = _OUT_PAD - out_dim
    w3p = jnp.pad(w3, ((0, 0), (0, pad_cols)))                    # zero weights
    pad_bias = -1e30 if action_size > 0 else 0.0                  # kill padded probs
    b3p = jnp.pad(b3, ((0, 0), (0, pad_cols)), constant_values=pad_bias)

    # --- batch tiling: pad B so every grid step is a full tile ---------------
    TB = min(block_b, _round_up(B, 8))
    Bp = _round_up(B, TB)
    if Bp != B:
        state = jnp.pad(state, ((0, Bp - B), (0, 0)))
    grid = (Bp // TB,)

    def resident(arr):
        # constant index_map -> block stays VMEM-resident across grid steps
        return pl.BlockSpec(arr.shape, lambda i: (0, 0))

    in_specs = [
        pl.BlockSpec((TB, S), lambda i: (i, 0)),        # streamed batch tile
        resident(w1), resident(b1),
        resident(w2), resident(b2),
        resident(w3p), resident(b3p),
    ]
    out_specs = pl.BlockSpec((TB, _OUT_PAD), lambda i: (i, 0))

    flops = 2 * Bp * (S * _HIDDEN + _HIDDEN * _HIDDEN + _HIDDEN * _OUT_PAD)
    transcendentals = Bp * _OUT_PAD if action_size > 0 else 0
    bytes_accessed = (Bp * S * 4 + Bp * _OUT_PAD * 4
                      + (w1.size + w2.size + w3p.size) * 2
                      + (b1.size + b2.size + b3p.size) * 4)

    kernel = functools.partial(_policy_kernel, use_softmax=(action_size > 0))

    out = pl.pallas_call(
        kernel,
        out_shape=jax.ShapeDtypeStruct((Bp, _OUT_PAD), jnp.float32),
        grid=grid,
        in_specs=in_specs,
        out_specs=out_specs,
        compiler_params=pltpu.CompilerParams(
            dimension_semantics=("parallel",)),
        cost_estimate=pl.CostEstimate(
            flops=flops,
            transcendentals=transcendentals,
            bytes_accessed=bytes_accessed),
    )(state, w1, b1, w2, b2, w3p, b3p)

    # strip batch padding and the lane padding of the output head
    return out[:B, :out_dim]


def init_policy_params(key, state_size, action_size):
    """Deterministic init mirroring nn.Linear's uniform(-1/sqrt(fan_in), ...).

    Weights are stored transposed to (in, out) in bf16 (MXU operands);
    biases stay f32 (VPU/EUP work is f32)."""
    out_dim = action_size if action_size > 0 else 1
    dims = [(state_size, _HIDDEN), (_HIDDEN, _HIDDEN), (_HIDDEN, out_dim)]
    params = []
    for fan_in, fan_out in dims:
        key, kw, kb = jax.random.split(key, 3)
        bound = 1.0 / math.sqrt(fan_in)
        w = jax.random.uniform(kw, (fan_in, fan_out), jnp.float32,
                               -bound, bound).astype(jnp.bfloat16)
        b = jax.random.uniform(kb, (1, fan_out), jnp.float32, -bound, bound)
        params += [w, b]
    return tuple(params)


def _reference_forward(state, params, action_size):
    """Pure-JAX reference performing the same bf16-operand / f32-acc math."""
    w1, b1, w2, b2, w3, b3 = params
    x = state.astype(jnp.bfloat16)
    h = jnp.maximum(
        jnp.dot(x, w1, preferred_element_type=jnp.float32) + b1, 0.0)
    h = jnp.maximum(
        jnp.dot(h.astype(jnp.bfloat16), w2,
                preferred_element_type=jnp.float32) + b2, 0.0)
    logits = jnp.dot(h.astype(jnp.bfloat16), w3,
                     preferred_element_type=jnp.float32) + b3
    if action_size > 0:
        return jax.nn.softmax(logits, axis=-1)
    return logits


if __name__ == "__main__":
    key = jax.random.PRNGKey(0)
    k_in, k_param = jax.random.split(key)

    batch = 8
    state_size = 32
    action_size = 4  # softmax branch; 0 exercises the value-head branch

    state = jax.random.normal(k_in, (batch, state_size), jnp.float32)
    params = init_policy_params(k_param, state_size, action_size)

    out = jax.block_until_ready(policy_net_forward(state, params, action_size))
    ref = _reference_forward(state, params, action_size)
    assert out.shape == (batch, action_size)
    assert jnp.allclose(out, ref, atol=2e-3, rtol=2e-3)
    # softmax rows sum to ~1 (approx reciprocal on the EUP)
    assert jnp.allclose(jnp.sum(out, axis=-1), 1.0, atol=2e-3)

    # value head (action_size == 0, no softmax) path
    params_v = init_policy_params(k_param, state_size, 0)
    out_v = jax.block_until_ready(policy_net_forward(state, params_v, 0))
    ref_v = _reference_forward(state, params_v, 0)
    assert out_v.shape == (batch, 1)
    assert jnp.allclose(out_v, ref_v, atol=1e-3, rtol=1e-3)

    print("KERNEL_OK")
</pallas_src>

<mosaic_0001>
module attributes {stable_mosaic.version = 11 : i64} {
  func.func @_policy_kernel(%arg0: i32, %arg1: memref<8x32xf32, #tpu.memory_space<vmem>>, %arg2: memref<32x128xbf16, #tpu.memory_space<vmem>>, %arg3: memref<1x128xf32, #tpu.memory_space<vmem>>, %arg4: memref<128x128xbf16, #tpu.memory_space<vmem>>, %arg5: memref<1x128xf32, #tpu.memory_space<vmem>>, %arg6: memref<128x128xbf16, #tpu.memory_space<vmem>>, %arg7: memref<1x128xf32, #tpu.memory_space<vmem>>, %arg8: memref<8x128xf32, #tpu.memory_space<vmem>>) attributes {dimension_semantics = [#tpu.dimension_semantics<parallel>], iteration_bounds = array<i64: 1>, scalar_prefetch = 0 : i64, scratch_operands = 0 : i64, tpu.core_type = #tpu.core_type<tc>, window_params = [{transform_indices = @transform_0, window_bounds = array<i64: 8, 32>}, {pipeline_mode = #tpu.pipeline_mode<synchronous>, transform_indices = @transform_1, window_bounds = array<i64: 32, 128>}, {pipeline_mode = #tpu.pipeline_mode<synchronous>, transform_indices = @transform_2, window_bounds = array<i64: 1, 128>}, {pipeline_mode = #tpu.pipeline_mode<synchronous>, transform_indices = @transform_3, window_bounds = array<i64: 128, 128>}, {pipeline_mode = #tpu.pipeline_mode<synchronous>, transform_indices = @transform_4, window_bounds = array<i64: 1, 128>}, {pipeline_mode = #tpu.pipeline_mode<synchronous>, transform_indices = @transform_5, window_bounds = array<i64: 128, 128>}, {pipeline_mode = #tpu.pipeline_mode<synchronous>, transform_indices = @transform_6, window_bounds = array<i64: 1, 128>}, {transform_indices = @transform_7, window_bounds = array<i64: 8, 128>}]} {
    %c0 = arith.constant 0 : index
    %c0_0 = arith.constant 0 : index
    %0 = vector.load %arg1[%c0, %c0_0] : memref<8x32xf32, #tpu.memory_space<vmem>>, vector<8x32xf32>
    %1 = arith.truncf %0 : vector<8x32xf32> to vector<8x32xbf16>
    %c0_1 = arith.constant 0 : index
    %c0_2 = arith.constant 0 : index
    %2 = vector.load %arg2[%c0_1, %c0_2] : memref<32x128xbf16, #tpu.memory_space<vmem>>, vector<32x128xbf16>
    %cst = arith.constant dense<0.000000e+00> : vector<8x128xf32>
    %3 = tpu.matmul %1, %2, %cst {dimension_numbers = #tpu.dot_dimension_numbers<[1], [0], [0], [1], [0, 0, 1, 1], [], []>} : vector<8x32xbf16>, vector<32x128xbf16>, vector<8x128xf32> -> vector<8x128xf32>
    %c0_3 = arith.constant 0 : index
    %c0_4 = arith.constant 0 : index
    %4 = vector.load %arg3[%c0_3, %c0_4] : memref<1x128xf32, #tpu.memory_space<vmem>>, vector<1x128xf32>
    %5 = vector.broadcast %4 : vector<1x128xf32> to vector<8x128xf32>
    %6 = arith.addf %3, %5 : vector<8x128xf32>
    %cst_5 = arith.constant 0.000000e+00 : f32
    %7 = vector.broadcast %cst_5 : f32 to vector<8x128xf32>
    %8 = arith.maximumf %6, %7 : vector<8x128xf32>
    %9 = arith.truncf %8 : vector<8x128xf32> to vector<8x128xbf16>
    %c0_6 = arith.constant 0 : index
    %c0_7 = arith.constant 0 : index
    %10 = vector.load %arg4[%c0_6, %c0_7] : memref<128x128xbf16, #tpu.memory_space<vmem>>, vector<128x128xbf16>
    %cst_8 = arith.constant dense<0.000000e+00> : vector<8x128xf32>
    %11 = tpu.matmul %9, %10, %cst_8 {dimension_numbers = #tpu.dot_dimension_numbers<[1], [0], [0], [1], [0, 0, 1, 1], [], []>} : vector<8x128xbf16>, vector<128x128xbf16>, vector<8x128xf32> -> vector<8x128xf32>
    %c0_9 = arith.constant 0 : index
    %c0_10 = arith.constant 0 : index
    %12 = vector.load %arg5[%c0_9, %c0_10] : memref<1x128xf32, #tpu.memory_space<vmem>>, vector<1x128xf32>
    %13 = vector.broadcast %12 : vector<1x128xf32> to vector<8x128xf32>
    %14 = arith.addf %11, %13 : vector<8x128xf32>
    %cst_11 = arith.constant 0.000000e+00 : f32
    %15 = vector.broadcast %cst_11 : f32 to vector<8x128xf32>
    %16 = arith.maximumf %14, %15 : vector<8x128xf32>
    %17 = arith.truncf %16 : vector<8x128xf32> to vector<8x128xbf16>
    %c0_12 = arith.constant 0 : index
    %c0_13 = arith.constant 0 : index
    %18 = vector.load %arg6[%c0_12, %c0_13] : memref<128x128xbf16, #tpu.memory_space<vmem>>, vector<128x128xbf16>
    %cst_14 = arith.constant dense<0.000000e+00> : vector<8x128xf32>
    %19 = tpu.matmul %17, %18, %cst_14 {dimension_numbers = #tpu.dot_dimension_numbers<[1], [0], [0], [1], [0, 0, 1, 1], [], []>} : vector<8x128xbf16>, vector<128x128xbf16>, vector<8x128xf32> -> vector<8x128xf32>
    %c0_15 = arith.constant 0 : index
    %c0_16 = arith.constant 0 : index
    %20 = vector.load %arg7[%c0_15, %c0_16] : memref<1x128xf32, #tpu.memory_space<vmem>>, vector<1x128xf32>
    %21 = vector.broadcast %20 : vector<1x128xf32> to vector<8x128xf32>
    %22 = arith.addf %19, %21 : vector<8x128xf32>
    %cst_17 = arith.constant dense<0xFF800000> : vector<8xf32>
    %23 = vector.multi_reduction <maximumf>, %22, %cst_17 [1] : vector<8x128xf32> to vector<8xf32>
    %24 = vector.shape_cast %23 : vector<8xf32> to vector<8x1xf32>
    %25 = vector.broadcast %24 : vector<8x1xf32> to vector<8x128xf32>
    %26 = arith.subf %22, %25 : vector<8x128xf32>
    %27 = math.exp %26 : vector<8x128xf32>
    %cst_18 = arith.constant dense<0.000000e+00> : vector<8xf32>
    %28 = vector.multi_reduction <add>, %27, %cst_18 [1] : vector<8x128xf32> to vector<8xf32>
    %29 = vector.shape_cast %28 : vector<8xf32> to vector<8x1xf32>
    %30 = tpu.reciprocal %29 {approx = true} : vector<8x1xf32> -> vector<8x1xf32>
    %31 = vector.broadcast %30 : vector<8x1xf32> to vector<8x128xf32>
    %32 = arith.mulf %27, %31 : vector<8x128xf32>
    %c0_19 = arith.constant 0 : index
    %c0_20 = arith.constant 0 : index
    %33 = vector.load %arg8[%c0_19, %c0_20] : memref<8x128xf32, #tpu.memory_space<vmem>>, vector<8x128xf32>
    tpu.vector_store %arg8[%c0_19, %c0_20], %32 {strides = array<i32>} : memref<8x128xf32, #tpu.memory_space<vmem>>, vector<8x128xf32>,
    return
  }
  func.func @transform_0(%arg0: i32) -> (i32, i32) {
    %c0_i32 = arith.constant 0 : i32
    %c0_i32_0 = arith.constant 0 : i32
    return %arg0, %c0_i32 : i32, i32
  }
  func.func @transform_1(%arg0: i32) -> (i32, i32) {
    %c0_i32 = arith.constant 0 : i32
    %c0_i32_0 = arith.constant 0 : i32
    %c0_i32_1 = arith.constant 0 : i32
    return %c0_i32, %c0_i32_0 : i32, i32
  }
  func.func @transform_2(%arg0: i32) -> (i32, i32) {
    %c0_i32 = arith.constant 0 : i32
    %c0_i32_0 = arith.constant 0 : i32
    %c0_i32_1 = arith.constant 0 : i32
    return %c0_i32, %c0_i32_0 : i32, i32
  }
  func.func @transform_3(%arg0: i32) -> (i32, i32) {
    %c0_i32 = arith.constant 0 : i32
    %c0_i32_0 = arith.constant 0 : i32
    %c0_i32_1 = arith.constant 0 : i32
    return %c0_i32, %c0_i32_0 : i32, i32
  }
  func.func @transform_4(%arg0: i32) -> (i32, i32) {
    %c0_i32 = arith.constant 0 : i32
    %c0_i32_0 = arith.constant 0 : i32
    %c0_i32_1 = arith.constant 0 : i32
    return %c0_i32, %c0_i32_0 : i32, i32
  }
  func.func @transform_5(%arg0: i32) -> (i32, i32) {
    %c0_i32 = arith.constant 0 : i32
    %c0_i32_0 = arith.constant 0 : i32
    %c0_i32_1 = arith.constant 0 : i32
    return %c0_i32, %c0_i32_0 : i32, i32
  }
  func.func @transform_6(%arg0: i32) -> (i32, i32) {
    %c0_i32 = arith.constant 0 : i32
    %c0_i32_0 = arith.constant 0 : i32
    %c0_i32_1 = arith.constant 0 : i32
    return %c0_i32, %c0_i32_0 : i32, i32
  }
  func.func @transform_7(%arg0: i32) -> (i32, i32) {
    %c0_i32 = arith.constant 0 : i32
    %c0_i32_0 = arith.constant 0 : i32
    return %arg0, %c0_i32 : i32, i32
  }
}

</mosaic_0001>

<bundles_post_ra>
// kernel: policy_net_forward.1
= control target key start
LH: loop header
LB: loop body
LE: loop exit
PB: predicated region body
PF: predicated region fallthrough
CT: control target
= control target key end

     0   :  { %v451_v0 = vmov 0.0   ;;  %vm452_vm0 = vmmov 0   ;;  %vm52_vm1 = vcmask 261120   ;;  %s586_s1 = inlined_call_operand.vmem [shape: bf16[32,128], index: 1, kind: input, shape index: {}]   ;;  %s587_s0 = inlined_call_operand.vmem [shape: f32[8,32], index: 0, kind: input, shape index: {}]   ;;  %s588_s3 = inlined_call_operand.vmem [shape: bf16[128,128], index: 3, kind: input, shape index: {}]   ;;  %s589_s5 = inlined_call_operand.vmem [shape: bf16[128,128], index: 5, kind: input, shape index: {}]   ;;  %s590_s2 = inlined_call_operand.vmem [shape: f32[1,128], index: 2, kind: input, shape index: {}]   ;;  %s591_s4 = inlined_call_operand.vmem [shape: f32[1,128], index: 4, kind: input, shape index: {}]   ;;  %s592_s6 = inlined_call_operand.vmem [shape: f32[1,128], index: 6, kind: input, shape index: {}]   ;;  %s593_s7 = inlined_call_operand.vmem [shape: f32[8,128], index: 7, kind: output, shape index: {}]  }
   0x1   :  { %379 = vmatprep.subr.bf16.mxu0 %v451_v0  ;;  %v429_v1 = vld [vmem:[%s586_s1 + $0x8] sm:$0xff]   ;;  %383 = vmatprep.mubr.msk.bf16.mxu0 %vm452_vm0, %v451_v0  ;;  %v430_v2 = vld [vmem:[%s586_s1] sm:$0xff]   ;;  %v431_v4 = vld [vmem:[%s588_s3 + $0x38] sm:$0xff]  }
   0x2   :  { %387 = vmatprep.subr.bf16.mxu1 %v451_v0  ;;  %403 = vmatprep.mubr.msk.bf16.mxu1 %vm452_vm0, %v451_v0  ;;  %v27_v3 = vld [vmem:[%s587_s0] sm:$0xff]  ;;  %v432_v6 = vld [vmem:[%s588_s3 + $0x30] sm:$0xff]   ;;  %v433_v7 = vld [vmem:[%s588_s3 + $0x28] sm:$0xff]  }
   0x3   :  { %380 = vmatpush3.bf16.msra.mxu0 %v429_v1  ;;  %v28_v5 = vpack.c.bf16 %v27_v3, %v27_v3  ;;  %388 = vmatpush3.bf16.msra.mxu1 %v431_v4  ;;  %v434_v8 = vld [vmem:[%s588_s3 + $0x20] sm:$0xff]   ;;  %v435_v9 = vld [vmem:[%s588_s3 + $0x18] sm:$0xff]   ;;  %v436_v10 = vld [vmem:[%s588_s3 + $0x10] sm:$0xff]  }
   0x4   :  { %381 = vmatprep.subr.bf16.mxu0 %v451_v0  ;;  %389 = vmatprep.subr.bf16.mxu1 %v451_v0  ;;  %v437_v11 = vld [vmem:[%s588_s3 + $0x8] sm:$0xff]   ;;  %v438_v12 = vld [vmem:[%s588_s3] sm:$0xff]   ;;  %v439_v13 = vld [vmem:[%s589_s5 + $0x38] sm:$0xff]  }
   0x5   :  { %v440_v14 = vld [vmem:[%s589_s5 + $0x30] sm:$0xff]   ;;  %v441_v15 = vld [vmem:[%s589_s5 + $0x28] sm:$0xff]   ;;  %v442_v16 = vld [vmem:[%s589_s5 + $0x20] sm:$0xff]  }
   0x6   :  { %v443_v17 = vld [vmem:[%s589_s5 + $0x18] sm:$0xff]   ;;  %v444_v18 = vld [vmem:[%s589_s5 + $0x10] sm:$0xff]   ;;  %v336_v19 = vld [vmem:[%s590_s2] ss:$0 sm:$0xff] }
   0x7   :  { %382 = vmatpush3.bf16.msra.mxu0 %v430_v2  ;;  %390 = vmatpush3.bf16.msra.mxu1 %v432_v6  ;;  %v445_v27 = vld [vmem:[%s589_s5 + $0x8] sm:$0xff]   ;;  %v446_v28 = vld [vmem:[%s589_s5] sm:$0xff]  }
   0x8   :  { %407 = vmatprep.subr.bf16.mxu0 %v451_v0  ;;  %391 = vmatprep.subr.bf16.mxu1 %v451_v0  ;;  %v340_v29 = vld [vmem:[%s591_s4] ss:$0 sm:$0xff] }
   0x9   :  { %v349_v37 = vld [vmem:[%s592_s6] ss:$0 sm:$0xff] }
   0xa   :  { %384 = vmatmul.mubr.msk.bf16.vlgmr.msra.gmra.mxu0 %vm52_vm1, %v28_v5 }
   0xb   :  { %423 = vmatprep.mubr.msk.bf16.mxu0 %vm452_vm0, %v451_v0  ;;  %392 = vmatpush3.bf16.msra.mxu1 %v433_v7 }
   0xc   :  { %393 = vmatprep.subr.bf16.mxu1 %v451_v0  ;;  %408 = vmatpush3.bf16.msra.mxu0 %v439_v13 }
   0xd   :  { %409 = vmatprep.subr.bf16.mxu0 %v451_v0 }
   0xf   :  { %394 = vmatpush3.bf16.msra.mxu1 %v434_v8 }
  0x10   :  { %395 = vmatprep.subr.bf16.mxu1 %v451_v0  ;;  %410 = vmatpush3.bf16.msra.mxu0 %v440_v14 }
  0x11   :  { %411 = vmatprep.subr.bf16.mxu0 %v451_v0 }
  0x13   :  { %396 = vmatpush3.bf16.msra.mxu1 %v435_v9 }
  0x14   :  { %397 = vmatprep.subr.bf16.mxu1 %v451_v0  ;;  %412 = vmatpush3.bf16.msra.mxu0 %v441_v15 }
  0x15   :  { %413 = vmatprep.subr.bf16.mxu0 %v451_v0 }
  0x17   :  { %398 = vmatpush3.bf16.msra.mxu1 %v436_v10 }
  0x18   :  { %399 = vmatprep.subr.bf16.mxu1 %v451_v0  ;;  %414 = vmatpush3.bf16.msra.mxu0 %v442_v16 }
  0x19   :  { %415 = vmatprep.subr.bf16.mxu0 %v451_v0 }
  0x1b   :  { %400 = vmatpush3.bf16.msra.mxu1 %v437_v11 }
  0x1c   :  { %401 = vmatprep.subr.bf16.mxu1 %v451_v0  ;;  %416 = vmatpush3.bf16.msra.mxu0 %v443_v17 }
  0x1d   :  { %417 = vmatprep.subr.bf16.mxu0 %v451_v0 }
  0x1f   :  { %402 = vmatpush3.bf16.msra.mxu1 %v438_v12 }
  0x20   :  { %418 = vmatpush3.bf16.msra.mxu0 %v444_v18 }
  0x21   :  { %419 = vmatprep.subr.bf16.mxu0 %v451_v0 }
  0x24   :  { %420 = vmatpush3.bf16.msra.mxu0 %v445_v27 }
  0x25   :  { %421 = vmatprep.subr.bf16.mxu0 %v451_v0 }
  0x28   :  { %422 = vmatpush3.bf16.msra.mxu0 %v446_v28 }
  0xca   :  { %v90_v20 = vpop.f32.mrf.mxu0 }
  0xcb   :  { %v91_v21 = vadd.f32 %v336_v19, %v90_v20 }
  0xcc   :  { %v385_v22 = vpop.f32.mrf.mxu0 }
  0xcd   :  { %v96_v23 = vmax.f32 %v91_v21, 0.0 }
  0xce   :  { %v93_v24 = vpop.f32.mrf.mxu0 }
  0xcf   :  { %v97_v25 = vpack.c.bf16 %v96_v23, %v96_v23 }
  0xd0   :  { %v386_v26 = vpop.f32.mrf.mxu0 }
  0xd1   :  { %404 = vmatmul.mubr.bf16.vlgmr.msra.gmra.mxu1 %v97_v25 }
 0x191   :  { %v203_v30 = vpop.f32.mrf.mxu1 }
 0x192   :  { %v204_v31 = vadd.f32 %v340_v29, %v203_v30 }
 0x193   :  { %v405_v32 = vpop.f32.mrf.mxu1 }
 0x194   :  { %v209_v33 = vmax.f32 %v204_v31, 0.0 }
 0x195   :  { %v206_v34 = vpop.f32.mrf.mxu1 }
 0x196   :  { %v210_v35 = vpack.c.bf16 %v209_v33, %v209_v33 }
 0x197   :  { %v406_v36 = vpop.f32.mrf.mxu1 }
 0x198   :  { %424 = vmatmul.mubr.bf16.vlgmr.msra.gmra.mxu0 %v210_v35 }
 0x258   :  { %v316_v38 = vpop.f32.mrf.mxu0 }
 0x259   :  { %v317_v39 = vadd.f32 %v349_v37, %v316_v38 }
 0x25a   :  { %v425_v40 = vpop.f32.mrf.mxu0 }
 0x25b   :  { %322 = vmax.xlane.f32.xlu0 %v317_v39 }
 0x25c   :  { %v319_v41 = vpop.f32.mrf.mxu0 }
 0x25e   :  { %v426_v42 = vpop.f32.mrf.mxu0 }
 0x2e4   :  { %v323_v43 = vpop.xlane.xlu0 %322 }
 0x2e5   :  { %v324_v44 = vsub.f32 %v317_v39, %v323_v43 }
 0x2e7   :  { %v325_v45 = vmul.f32 1.442695, %v324_v44 }
 0x2e9   :  { %447 = vpow2.f32 %v325_v45 }
 0x2f6   :  { %v448_v46 = vpop.eup %447 }
 0x2f7   :  { %327 = vadd.xlane.f32.xlu0 %v448_v46 }
 0x380   :  { %v328_v47 = vpop.xlane.xlu0 %327 }
 0x381   :  { %449 = vrcp.f32 %v328_v47 }
 0x38e   :  { %v450_v48 = vpop.eup %449 }
 0x38f   :  { %v330_v49 = vmul.f32 %v450_v48, %v448_v46 }
 0x391   :  { %331 = vst [vmem:[%s593_s7] sm:$0xff] %v330_v49 }

</bundles_post_ra>
